<compile_context>
chip_gen: v5e
topology: v5e:2x2
jax: 0.10.0
libtpu: 0.0.40
codegen_flags: <defaults>
</compile_context>

<pallas_src>
import math

import jax
import jax.numpy as jnp
from jax.experimental import pallas as pl
from jax.experimental.pallas import tpu as pltpu


# ---------------------------------------------------------------------------
# Hardware caps (generation-aware, conservative)
# ---------------------------------------------------------------------------
def _device_caps():
    """Returns (mxu_width, per-core VMEM budget in bytes)."""
    kind = ""
    try:
        kind = jax.devices()[0].device_kind.lower()
    except Exception:
        pass
    if any(t in kind for t in ("v2", "v3", "v4", "v5")):
        mxu_w, hw_vmem = 128, 128 * 1024 * 1024
    elif "v6" in kind:
        mxu_w, hw_vmem = 256, 128 * 1024 * 1024
    else:  # v7x and unknown/newer chips: assume 64 MiB per TensorCore
        mxu_w, hw_vmem = 256, 64 * 1024 * 1024
    cap = hw_vmem
    try:
        reported = int(getattr(pltpu.get_tpu_info(), "vmem_capacity_bytes", hw_vmem))
        cap = min(cap, reported)
    except Exception:
        pass
    return mxu_w, max(cap, 32 * 1024 * 1024)


def _round_up(v, m):
    return ((v + m - 1) // m) * m


# ---------------------------------------------------------------------------
# Kernels
# ---------------------------------------------------------------------------
def _faclin_kernel_single(x_ref, w_ref, o_ref):
    """Single merged group (g == D): one lane-dense matmul, no relayouts."""
    o_ref[...] = jnp.dot(
        x_ref[...], w_ref[...], preferred_element_type=jnp.float32
    ).astype(o_ref.dtype)


def _faclin_kernel_multi(x_ref, *args):
    """Multi-group chain.  x_ref is (tb, D//g1, g1); o_ref is (tb, g_m, D//g_m).

    Per group: free leading-dim merge -> 2-D matmul contracting the minor axis
    -> one swapaxes of the last two dims (the only materialized relayout)
    -> (usually free) resplit so the next group's axis becomes minor.
    """
    w_refs = args[:-1]
    o_ref = args[-1]
    tb = x_ref.shape[0]
    D = x_ref.shape[1] * x_ref.shape[2]
    step_dtype = jnp.bfloat16 if x_ref.dtype == jnp.bfloat16 else jnp.float32

    x = x_ref[...]
    n = len(w_refs)
    for k, w_ref in enumerate(w_refs):
        g = w_ref.shape[0]
        rows = tb * (D // g)
        y = jnp.dot(x.reshape(rows, g), w_ref[...],
                    preferred_element_type=jnp.float32)
        y = jnp.swapaxes(y.reshape(tb, D // g, g), 1, 2)  # (tb, g', D//g)
        if k + 1 < n:
            g_next = w_refs[k + 1].shape[0]
            x = y.reshape(tb, D // g_next, g_next).astype(step_dtype)
        else:
            o_ref[...] = y.astype(o_ref.dtype)


# ---------------------------------------------------------------------------
# Host-side wrapper
# ---------------------------------------------------------------------------
def faclin_pallas(x, weights):
    """y = faclin(x, weights): x (B, D), each weight (g, g), prod(g) == D."""
    B, D = x.shape
    gs = [int(w.shape[0]) for w in weights]
    assert math.prod(gs) == D

    _, budget = _device_caps()
    usable = int(0.70 * budget)
    itemsize = x.dtype.itemsize
    # Weights are double-buffered by the pipeline even with a constant index_map.
    # TODO(synk): pl.Buffered(1) on the weight BlockSpecs would halve this; kept at
    # the default double-buffering for lowering robustness.
    w_resident = 2 * sum(int(w.size) * w.dtype.itemsize for w in weights)
    n_temps = 2 if len(weights) == 1 else 3
    row_bytes = 4 * D * itemsize + n_temps * D * 4  # in/out double-buffered + f32 temps

    # Batch tile: <=512 rows, sublane aligned, >=4 grid steps when B allows,
    # then shrink until the VMEM budget is respected.
    tb = min(512, _round_up(max(B, 1), 8))
    tb = min(tb, max(8, _round_up(-(-B // 4), 8)))
    while tb > 8 and w_resident + tb * row_bytes > usable:
        tb = max(8, ((tb // 2) // 8) * 8)

    grid = ((B + tb - 1) // tb,)  # ragged last block handled by Pallas (no jnp.pad)
    cparams = pltpu.CompilerParams(
        dimension_semantics=("parallel",),
        vmem_limit_bytes=int(0.9 * budget),
    )

    if len(weights) == 1:
        return pl.pallas_call(
            _faclin_kernel_single,
            out_shape=jax.ShapeDtypeStruct((B, D), x.dtype),
            grid=grid,
            in_specs=[pl.BlockSpec((tb, D), lambda i: (i, 0)),
                      pl.BlockSpec((D, D), lambda i: (0, 0))],
            out_specs=pl.BlockSpec((tb, D), lambda i: (i, 0)),
            compiler_params=cparams,
        )(x, weights[0])

    g1, gm = gs[0], gs[-1]
    x3 = x.reshape(B, D // g1, g1)  # free (metadata-only) HBM reshape
    in_specs = [pl.BlockSpec((tb, D // g1, g1), lambda i: (i, 0, 0))]
    for g in gs:
        in_specs.append(pl.BlockSpec((g, g), lambda i: (0, 0)))
    out3 = pl.pallas_call(
        _faclin_kernel_multi,
        out_shape=jax.ShapeDtypeStruct((B, gm, D // gm), x.dtype),
        grid=grid,
        in_specs=in_specs,
        out_specs=pl.BlockSpec((tb, gm, D // gm), lambda i: (i, 0, 0)),
        compiler_params=cparams,
    )(x3, *weights)
    return out3.reshape(B, D)


# ---------------------------------------------------------------------------
# Weight preprocessing: cost-model-driven merging of consecutive factors
# ---------------------------------------------------------------------------
def _partition_factor_sizes(sizes, itemsize, mxu_w, budget):
    """Pick the consecutive grouping minimizing estimated MXU passes plus a
    per-group relayout penalty, under per-group / total weight VMEM caps.
    Returns the list of group lengths."""
    n = len(sizes)
    D = math.prod(sizes)
    max_w_bytes = min(16 * 1024 * 1024, budget // 4)
    relayout_pen = 3 * max(D // 128, 1)

    best_key, best_lens = None, None
    for mask in range(1 << max(n - 1, 0)):
        group_sizes, group_lens = [], []
        g, ln = 1, 0
        for i, f in enumerate(sizes):
            g *= f
            ln += 1
            if i == n - 1 or (mask >> i) & 1:
                group_sizes.append(g)
                group_lens.append(ln)
                g, ln = 1, 0
        w_bytes = sum(s * s * itemsize for s in group_sizes)
        if max(s * s * itemsize for s in group_sizes) > max_w_bytes:
            continue
        if 2 * w_bytes > int(0.55 * budget):
            continue
        # MXU passes per 8 batch rows: (D//s) * ceil(s/mxu_w)^2 per group.
        cost = sum((D // s) * (-(-s // mxu_w)) ** 2 for s in group_sizes)
        if len(group_sizes) > 1:
            cost += len(group_sizes) * relayout_pen
        key = (cost, len(group_sizes), w_bytes)
        if best_key is None or key < best_key:
            best_key, best_lens = key, group_lens
    if best_lens is None:  # nothing fits the caps: keep the original factors
        best_lens = [1] * n
    return best_lens


def _merge_factors(ws, mxu_w, budget):
    """Merge consecutive factor weights into Kronecker products per grouping."""
    if not ws:
        return list(ws)
    sizes = [int(w.shape[0]) for w in ws]
    lens = _partition_factor_sizes(sizes, ws[0].dtype.itemsize, mxu_w, budget)
    merged, pos = [], 0
    for ln in lens:
        grp = ws[pos:pos + ln]
        pos += ln
        m = grp[-1]
        for w in reversed(grp[:-1]):
            m = jnp.kron(m, w)
        merged.append(m)
    return merged


def faclin_ref(x, weights):
    """Pure-JAX per-factor reference with identical semantics (correctness check)."""
    B, _ = x.shape
    y = x
    for w in weights:
        f = w.shape[0]
        y = y.reshape(-1, f) @ w
        y = y.reshape(B, -1, f)
        y = jnp.swapaxes(y, 1, 2).reshape(B, -1)
    return y


class L3:
    """JAX/Pallas port of the PyTorch L3 module (forward pass only)."""
    # TODO(synk): FaclinF.backward is a custom autograd rule; only forward is ported.

    def __init__(self, factors, W):
        self.factors = tuple(int(f) for f in factors)
        self.ws = []
        acc = 0
        for f in self.factors:
            self.ws.append(W[acc:acc + f * f].reshape(f, f))
            acc += f * f
        mxu_w, budget = _device_caps()
        # TODO(synk): bf16 weights/activations would roughly double throughput but
        # loosen the f32 1e-4 tolerance used here; kept in the parameter dtype.
        self.merged_ws = _merge_factors(self.ws, mxu_w, budget)

    def __call__(self, x):
        return faclin_pallas(x, self.merged_ws)


# ---------------------------------------------------------------------------
# Demo / correctness check
# ---------------------------------------------------------------------------
if __name__ == "__main__":
    def run_case(factors, B, key):
        D = math.prod(factors)
        kW, kx = jax.random.split(key)
        W_flat = jax.random.normal(
            kW, (sum(f * f for f in factors),), dtype=jnp.float32) * 0.1
        x = jax.random.normal(kx, (B, D), dtype=jnp.float32)

        mod = L3(factors, W_flat)
        out = jax.block_until_ready(mod(x))

        ref = faclin_ref(x, mod.ws)  # original per-factor reference
        assert out.shape == (B, D), out.shape
        err = float(jnp.max(jnp.abs(out - ref)))
        assert jnp.allclose(out, ref, atol=1e-4, rtol=1e-4), err

    key = jax.random.PRNGKey(0)
    k1, k2, k3 = jax.random.split(key, 3)
    # Single merged 128-wide group, two grid steps.
    run_case((8, 16), 16, k1)
    # Merge heuristic (fully merges on v6e/v7x) + ragged (partial) last block.
    run_case((16, 8, 16), 10, k2)
    # True multi-group path: two lane-dense 128x128 groups, D = 16384.
    run_case((128, 128), 24, k3)

    print("KERNEL_OK")
</pallas_src>

<mosaic_0001>
module attributes {stable_mosaic.version = 11 : i64} {
  func.func @_faclin_kernel_single(%arg0: i32, %arg1: memref<8x128xf32, #tpu.memory_space<vmem>>, %arg2: memref<128x128xf32, #tpu.memory_space<vmem>>, %arg3: memref<8x128xf32, #tpu.memory_space<vmem>>) attributes {dimension_semantics = [#tpu.dimension_semantics<parallel>], iteration_bounds = array<i64: 2>, scalar_prefetch = 0 : i64, scratch_operands = 0 : i64, tpu.core_type = #tpu.core_type<tc>, window_params = [{transform_indices = @transform_0, window_bounds = array<i64: 8, 128>}, {pipeline_mode = #tpu.pipeline_mode<synchronous>, transform_indices = @transform_1, window_bounds = array<i64: 128, 128>}, {transform_indices = @transform_2, window_bounds = array<i64: 8, 128>}]} {
    %c0 = arith.constant 0 : index
    %c0_0 = arith.constant 0 : index
    %0 = vector.load %arg1[%c0, %c0_0] : memref<8x128xf32, #tpu.memory_space<vmem>>, vector<8x128xf32>
    %c0_1 = arith.constant 0 : index
    %c0_2 = arith.constant 0 : index
    %1 = vector.load %arg2[%c0_1, %c0_2] : memref<128x128xf32, #tpu.memory_space<vmem>>, vector<128x128xf32>
    %cst = arith.constant dense<0.000000e+00> : vector<8x128xf32>
    %2 = tpu.matmul %0, %1, %cst {dimension_numbers = #tpu.dot_dimension_numbers<[1], [0], [0], [1], [0, 0, 1, 1], [], []>} : vector<8x128xf32>, vector<128x128xf32>, vector<8x128xf32> -> vector<8x128xf32>
    %c0_3 = arith.constant 0 : index
    %c0_4 = arith.constant 0 : index
    %3 = vector.load %arg3[%c0_3, %c0_4] : memref<8x128xf32, #tpu.memory_space<vmem>>, vector<8x128xf32>
    tpu.vector_store %arg3[%c0_3, %c0_4], %2 {strides = array<i32>} : memref<8x128xf32, #tpu.memory_space<vmem>>, vector<8x128xf32>,
    return
  }
  func.func @transform_0(%arg0: i32) -> (i32, i32) {
    %c0_i32 = arith.constant 0 : i32
    %c0_i32_0 = arith.constant 0 : i32
    return %arg0, %c0_i32 : i32, i32
  }
  func.func @transform_1(%arg0: i32) -> (i32, i32) {
    %c0_i32 = arith.constant 0 : i32
    %c0_i32_0 = arith.constant 0 : i32
    %c0_i32_1 = arith.constant 0 : i32
    return %c0_i32, %c0_i32_0 : i32, i32
  }
  func.func @transform_2(%arg0: i32) -> (i32, i32) {
    %c0_i32 = arith.constant 0 : i32
    %c0_i32_0 = arith.constant 0 : i32
    return %arg0, %c0_i32 : i32, i32
  }
}

</mosaic_0001>

<bundles_post_ra>
// kernel: tpu_custom_call.1
= control target key start
LH: loop header
LB: loop body
LE: loop exit
PB: predicated region body
PF: predicated region fallthrough
CT: control target
= control target key end

     0   :  { %7 = vsyncpa [#allocation3], 0  ;;  %s678_s0 = inlined_call_operand.hbm [shape: f32[16,128], index: 0, kind: input, shape index: {}]   ;;  %s679_s1 = inlined_call_operand.hbm [shape: f32[128,128], index: 1, kind: input, shape index: {}]   ;;  %s680_s2 = inlined_call_operand.hbm [shape: f32[16,128], index: 2, kind: output, shape index: {}]  }
   0x1   :  { %9 = vsyncpa [#allocation3 + $0x1], 0 }
   0x2   :  { %10 = vsyncpa [#allocation6], 0 }
   0x3   :  { %11 = vsyncpa [#allocation4], 0 }
   0x4   :  { %13 = vsyncpa [#allocation4 + $0x1], 0  ;;  %s535_s9 = smov 0   ;;  %s537_s10 = smov 0  }
   0x5   :  { %s539_s11 = smov 0   ;;  %s541_s12 = smov 0  }
   0x6 LB: > { %s108_s15 = sshll.u32 %s679_s1, 4  ;;  %s559_s16 = sadd.s32 4294967295, %s515_s12   ;;  %s515_s12 = sphi %s541_s12, %s690_s12   ;;  %s511_s11 = sphi %s539_s11, %s689_s11   ;;  %s507_s10 = sphi %s537_s10, %s688_s10   ;;  %s503_s9 = sphi %s535_s9, %s687_s9   ;;  %s109_s15 = int_to_ptr.hbm [resolvable:$true] %s108_s15 }
   0x7   : > { %p313_p0 = scmp.ge.s32.totalorder %s515_s12, 1  ;;  %p40_p1 = scmp.eq.s32.totalorder %s559_s16, 0 }
   0x8   : > { %p97_p2 = scmp.lt.s32.totalorder %s515_s12, 3  ;;  %s517_s18 = smov [#allocation5]  }
   0x9   : > { %s110_s19 = sshll.u32 %s517_s18, 4  ;;  %s518_s20 = smov 128   ;;  %s111_s19 = int_to_ptr.vmem [resolvable:$true] %s110_s19 }
   0xa   : > { %p564_p3 = pnand %p313_p0, %p97_p2  ;;  %s519_s21 = smov 8  }
   0xb   : > { %s312_s22 = sadd.s32 4294967294, %s515_s12   ;;  %s575_s23 = sadd.s32 1, %s515_s12  }
   0xc   : > { %p334_p4 = pneg %p564_p3  ;;  %s26_s24 = sadd.s32 1, %s511_s11 }
   0xd   : > { %s23_s25 = ssub.s32 %s515_s12, %s575_s23  ;;  %p33_p7 = scmp.ne.s32.totalorder %s511_s11, %s507_s10 }
   0xe   : > { %p335_p6 = pnand %p334_p4, %p40_p1  ;;  %p24_p8 = scmp.eq.s32.totalorder %s23_s25, 0 }
   0xf   : > { %p34_p9 = scmp.eq.s32.totalorder %s515_s12, 0  ;;  %p39_p10 = scmp.ne.s32.totalorder %s507_s10, %s503_s9 }
  0x10   : > { %337 = dma.hbm_to_vmem [thread:$0]  (!%p335_p6), %s109_s15, 2048, %s111_s19, [#allocation6], %s518_s20, %s518_s20, %s519_s21  }
  0x11   : > { %p84_p11 = scmp.eq.s32.totalorder %s559_s16, 1  ;;  %p591_p12 = por %p40_p1, %p39_p10 }
  0x12   : > { %s587_s26 = scalar_select %p24_p8, %s511_s11, %s26_s24  }
  0x13   : > { %p595_p13 = por %p84_p11, %p33_p7  ;;  %p90_p0 = scmp.eq.s32.totalorder %s312_s22, 1 }
  0x14   : > { %p35_p2 = por %p34_p9, %p33_p7  ;;  %s124_s29 = sand.u32 1, %s511_s11  }
  0x15   : > { %p600_p4 = por %p90_p0, %p39_p10  ;;  %p347_p6 = scmp.lt.s32.totalorder %s515_s12, 2 }
  0x16   : > { %s316_s3 = sshll.u32 %s124_s29, 3  ;;  %s317_s4 = sshll.u32 %s515_s12, 3 }
  0x17   : > { %s132_s7 = scalar_lea.hbm %s678_s0, %s317_s4  ;;  %s128_s13 = scalar_lea.vmem [#allocation2], %s316_s3 }
  0x18   : > { %s134_s8 = sshll.u32 %s132_s7, 4  ;;  %s136_s14 = sshll.u32 %s128_s13, 4  ;;  %s135_s8 = int_to_ptr.hbm [resolvable:$true] %s134_s8  ;;  %s137_s14 = int_to_ptr.vmem [resolvable:$true] %s136_s14 }
  0x19   : > { %p609_p8 = pnand %p347_p6, %p35_p2  ;;  %s125_s18 = scalar_lea.sflag [#allocation3], %s124_s29 }
  0x1a   : > { %s415_s19 = sshra.s32 %s135_s8, 4  ;;  %s422_s24 = scalar_lea.hbm %s678_s0, 16  ;;  %s416_s19 = int_to_ptr.hbm [resolvable:$true] %s415_s19 }
  0x1b   : > { %s417_s20 = scalar_lea.hbm %s416_s19, 8  ;;  %p419_p9 = pneg %p609_p8 }
  0x1c   : > { %p418_p7 = scmp.ne.s32.totalorder %s416_s19, %s417_s20  ;;  %p423_p0 = scmp.lt.s32.totalorder %s416_s19, %s678_s0 }
  0x1d   : > { %p424_p2 = scmp.lt.s32.totalorder %s422_s24, %s417_s20 }
  0x1e   : > { %p420_p10 = pnand %p419_p9, %p418_p7 }
  0x1f   : > { %p425_p6 = por %p424_p2, %p423_p0 }
  0x20   : > { %p421_p11 = pneg %p420_p10 }
  0x22   : > { %p426_p5 = pnand %p425_p6, %p421_p11 }
  0x24   : > { %429 = shalt.err (!%p426_p5)
}
  0x25   : > { %341 = dma.hbm_to_vmem [thread:$0]  (!%p609_p8), %s135_s8, 128, %s137_s14, %s125_s18  }
  0x26   : > { %145 = sbr.rel (%p564_p3) target bundleno = 207 (0xcf), region = 28  ;;  %s626_s29 = sand.u32 (!%p564_p3), 1, %s507_s10  }
  0x27   : > { %s319_s4 = sshll.u32 (!%p564_p3), %s626_s29, 3  ;;  %s148_s5 = scalar_lea.sflag (!%p564_p3), [#allocation3], %s626_s29 }
  0x28   : > { %s632_s6 = scalar_lea.vmem (!%p564_p3), [#allocation2], %s319_s4 }
  0x2b   : > { %490 = dma.done.wait (%p591_p12), %s148_s5, 128  }
  0x2c   : > { %492 = vsyncadd (%p591_p12), %s148_s5, 4294967168 }
  0x2d   : > { %494 = dma.done.wait (%p40_p1), [#allocation6], 2048  }
  0x2e   : > { %496 = vsyncadd (%p40_p1), [#allocation6], 4294965248  ;;  %v194_v0 = vld [vmem:[#allocation5 + $0x78] sm:$0xff]  ;;  %v193_v1 = vld [vmem:[#allocation5 + $0x70] sm:$0xff]  ;;  %s323_s17 = sshll.u32 %s559_s16, 3  ;;  %s177_s13 = scalar_lea.vmem [#allocation7], %s319_s4 }
  0x2f   : > { %195 = vmatpush.msra.mxu0 %v194_v0  ;;  %v192_v2 = vld [vmem:[#allocation5 + $0x68] sm:$0xff]  ;;  %v191_v3 = vld [vmem:[#allocation5 + $0x60] sm:$0xff]  ;;  %v190_v4 = vld [vmem:[#allocation5 + $0x58] sm:$0xff]  ;;  %s227_s8 = scalar_lea.hbm %s680_s2, %s323_s17  ;;  %s229_s14 = sshll.u32 %s177_s13, 4  ;;  %s230_s14 = int_to_ptr.vmem [resolvable:$true] %s229_s14 }
  0x30   : > { %v189_v5 = vld [vmem:[#allocation5 + $0x50] sm:$0xff]  ;;  %v188_v6 = vld [vmem:[#allocation5 + $0x48] sm:$0xff]  ;;  %v187_v7 = vld [vmem:[#allocation5 + $0x40] sm:$0xff]  ;;  %s231_s15 = sshll.u32 %s227_s8, 4  ;;  %s217_s18 = scalar_lea.sflag [#allocation4], %s626_s29  ;;  %s232_s15 = int_to_ptr.hbm [resolvable:$true] %s231_s15 }
  0x31   : > { %196 = vmatpush.msra.mxu0 %v193_v1  ;;  %v186_v8 = vld [vmem:[#allocation5 + $0x38] sm:$0xff]  ;;  %v185_v9 = vld [vmem:[#allocation5 + $0x30] sm:$0xff]  ;;  %v184_v10 = vld [vmem:[#allocation5 + $0x28] sm:$0xff]  ;;  %s459_s19 = sshra.s32 %s232_s15, 4  ;;  %s465_s22 = scalar_lea.hbm %s680_s2, 16  ;;  %s460_s19 = int_to_ptr.hbm [resolvable:$true] %s459_s19 }
  0x32   : > { %v183_v11 = vld [vmem:[#allocation5 + $0x20] sm:$0xff]  ;;  %v182_v12 = vld [vmem:[#allocation5 + $0x18] sm:$0xff]  ;;  %v181_v13 = vld [vmem:[#allocation5 + $0x10] sm:$0xff]  ;;  %s461_s20 = scalar_lea.hbm %s460_s19, 8  ;;  %p466_p12 = scmp.lt.s32.totalorder %s460_s19, %s680_s2 }
  0x33   : > { %197 = vmatpush.msra.mxu0 %v192_v2  ;;  %v180_v14 = vld [vmem:[#allocation5 + $0x8] sm:$0xff]  ;;  %v179_v15 = vld [vmem:[#allocation5] sm:$0xff]  ;;  %v178_v16 = vld [vmem:[%s632_s6] sm:$0xff]  ;;  %p462_p1 = scmp.ne.s32.totalorder %s460_s19, %s461_s20  ;;  %p467_p8 = scmp.lt.s32.totalorder %s465_s22, %s461_s20 }
  0x35   : > { %198 = vmatpush.msra.mxu0 %v191_v3  ;;  %p463_p3 = pnand %p462_p1, %p595_p13  ;;  %p468_p7 = por %p467_p8, %p466_p12 }
  0x37   : > { %199 = vmatpush.msra.mxu0 %v190_v4  ;;  %p464_p5 = pneg %p463_p3 }
  0x39   : > { %200 = vmatpush.msra.mxu0 %v189_v5  ;;  %p469_p9 = pnand %p468_p7, %p464_p5 }
  0x3b   : > { %201 = vmatpush.msra.mxu0 %v188_v6 }
  0x3d   : > { %202 = vmatpush.msra.mxu0 %v187_v7 }
  0x3f   : > { %203 = vmatpush.msra.mxu0 %v186_v8 }
  0x41   : > { %204 = vmatpush.msra.mxu0 %v185_v9 }
  0x43   : > { %205 = vmatpush.msra.mxu0 %v184_v10 }
  0x45   : > { %206 = vmatpush.msra.mxu0 %v183_v11 }
  0x47   : > { %207 = vmatpush.msra.mxu0 %v182_v12 }
  0x49   : > { %208 = vmatpush.msra.mxu0 %v181_v13 }
  0x4b   : > { %209 = vmatpush.msra.mxu0 %v180_v14 }
  0x4d   : > { %210 = vmatpush.msra.mxu0 %v179_v15 }
  0x4e   : > { %211 = vmatmul.f32.vlgmr.msra.gmra.mxu0 %v178_v16 }
  0xcb   : > { %v212_v17 = vpop.f32.mrf.mxu0 }
  0xcc   : > { %215 = vst [vmem:[%s177_s13] sm:$0xff] %v212_v17 }
  0xcd   : > { %472 = shalt.err (!%p469_p9)
}
  0xce   : > { %332 = dma.vmem_to_hbm [thread:$0]  (%p595_p13), %s230_s14, 128, %s232_s15, %s217_s18  }
  0xcf PF: > { %s243_s3 = sand.u32 1, %s503_s9   ;;  %p686_p10 = scmp.ge.s32.totalorder %s515_s12, 2 }
  0xd0   : > { %s244_s29 = scalar_lea.sflag [#allocation4], %s243_s3 }
  0xd1   : > { %p343_p11 = pnand %p686_p10, %p600_p4 }
  0xd3   : > { %p344_p0 = pneg %p343_p11 }
  0xd5   : > { %498 = dma.done.wait (%p344_p0), %s244_s29, 128  }
  0xd6   : > { %500 = vsyncadd (%p344_p0), %s244_s29, 4294967168  ;;  %p16_p2 = scmp.ge.s32.totalorder %s575_s23, 4   ;;  %s687_s9 = smov %s507_s10 }
  0xd7   : > { %s688_s10 = smov %s511_s11  ;;  %s689_s11 = smov %s587_s26 }
  0xd8   : > { %s690_s12 = smov %s575_s23  ;;  %18 = sbr.rel (!%p16_p2) target bundleno = 6 (0x6), region = 77 }
  0xdd   :  { %250 = vsyncpa [#allocation3], 1 }
  0xde   :  { %252 = vsyncpa [#allocation3 + $0x1], 1 }
  0xdf   :  { %253 = vsyncpa [#allocation6], 1 }
  0xe0   :  { %254 = vsyncpa [#allocation4], 1 }
  0xe1   :  { %256 = vsyncpa [#allocation4 + $0x1], 1 }

</bundles_post_ra>
